<compile_context>
chip_gen: v5e
topology: v5e:2x2
jax: 0.10.0
libtpu: 0.0.40
codegen_flags: <defaults>
</compile_context>

<pallas_src>
import jax
import jax.numpy as jnp
from jax.experimental import pallas as pl
from jax.experimental.pallas import tpu as pltpu

IN_S = 4                     # cartpole state features (x, xdot, theta, thetadot)
IN_G = 2                     # goal features
IN_DIM = IN_S + IN_G         # 6
IN_PAD = 8                   # layer-1 K padded to 8 (zero columns / zero rows)
H1, H1P = 300, 384           # hidden 1 (padded to lane multiple)
H2, H2P = 400, 512           # hidden 2 (padded to lane multiple)
OUT_DIM = 2                  # logits (stored as a narrow 2-lane block)

_BATCH_TILE = 1024           # max M tile for large rollout batches


def _round_up(x, m):
    return ((x + m - 1) // m) * m


def _choose_tile(batch):
    """Pick (tm, padded_batch): minimal padding, tm % 16 == 0, >=2 tiles on big B."""
    n_tiles = -(-batch // _BATCH_TILE)          # ceil
    if batch >= 512 and n_tiles < 2:
        n_tiles = 2                             # keep >=2 grid steps for v7x megacore
    tm = _round_up(-(-batch // n_tiles), 16)
    return tm, tm * n_tiles


def _bf16_epilogue_supported():
    """bf16 VPU exists on v6e / v7x; v5e and older do elementwise in f32."""
    try:
        kind = jax.devices()[0].device_kind.lower()
    except Exception:
        return False
    for tag in ("v2", "v3", "v4", "v5"):
        if tag in kind:
            return False
    return True


def _policy_kernel(x_ref, w1_ref, b1_ref, w2_ref, b2_ref, w3_ref, b3_ref, o_ref):
    """One batch tile of the full MLP.  bf16 matmul inputs, f32 accumulation.

    The bias-add/ReLU epilogue runs in the dtype of the packed biases
    (bf16 on v6e/v7x, f32 on v5e) — chosen host-side in pack_params.
    """
    # Layer 1: Linear(6, 300) + ReLU (concat folded into the pre-packed K=8 input).
    h1 = jnp.dot(x_ref[...], w1_ref[...], preferred_element_type=jnp.float32)
    h1 = jnp.maximum(h1.astype(b1_ref.dtype) + b1_ref[...], 0).astype(jnp.bfloat16)
    # TODO(synk): Dropout(p=0.2) is identity in eval mode; a training path would
    # need pltpu.prng_seed + pltpu.prng_random_bits masking.
    # Layer 2: Linear(300, 400) + ReLU.
    h2 = jnp.dot(h1, w2_ref[...], preferred_element_type=jnp.float32)
    h2 = jnp.maximum(h2.astype(b2_ref.dtype) + b2_ref[...], 0).astype(jnp.bfloat16)
    # Layer 3: Linear(400, 2) — narrow 2-lane store (masked vst, negligible cost).
    out = jnp.dot(h2, w3_ref[...], preferred_element_type=jnp.float32) + b3_ref[...]
    o_ref[...] = out.astype(o_ref.dtype)


def cartpole_policy_forward(s, g, h, kparams):
    """Pallas equivalent of CartpolePolicyNet.forward(s, g, h) (eval mode)."""
    del h  # unused, matching the PyTorch module
    w1, b1, w2, b2, w3, b3 = kparams

    B = s.shape[0]
    tm, bp = _choose_tile(B)

    # Pre-pack s||g||zeros into one (bp, 8) bf16 array (single K=8 matmul input).
    x = jnp.concatenate((s, g), axis=-1).astype(jnp.bfloat16)
    x = jnp.pad(x, ((0, bp - B), (0, IN_PAD - IN_DIM)))

    def const_spec(arr):
        # Constant block index -> weights/biases stay VMEM-resident across
        # batch-grid steps (no re-DMA).
        return pl.BlockSpec(arr.shape, lambda i: (0,) * arr.ndim)

    out = pl.pallas_call(
        _policy_kernel,
        out_shape=jax.ShapeDtypeStruct((bp, OUT_DIM), jnp.float32),
        grid=(bp // tm,),
        in_specs=[
            pl.BlockSpec((tm, IN_PAD), lambda i: (i, 0)),
            const_spec(w1), const_spec(b1),
            const_spec(w2), const_spec(b2),
            const_spec(w3), const_spec(b3),
        ],
        out_specs=pl.BlockSpec((tm, OUT_DIM), lambda i: (i, 0)),
        compiler_params=pltpu.CompilerParams(
            dimension_semantics=("parallel",)),
    )(x, w1, b1, w2, b2, w3, b3)

    return out[:B]


def init_params(key):
    """PyTorch-Linear-style uniform init; weights stored (in, out)."""
    ks = jax.random.split(key, 6)

    def linear(kw, kb, fan_in, fan_out):
        bound = float(fan_in) ** -0.5
        w = jax.random.uniform(kw, (fan_in, fan_out), jnp.float32, -bound, bound)
        b = jax.random.uniform(kb, (1, fan_out), jnp.float32, -bound, bound)
        return w, b

    w1, b1 = linear(ks[0], ks[1], IN_DIM, H1)
    w2, b2 = linear(ks[2], ks[3], H1, H2)
    w3, b3 = linear(ks[4], ks[5], H2, OUT_DIM)
    return (w1, b1, w2, b2, w3, b3)


def pack_params(params, bf16_epilogue):
    """Zero-pad feature dims; weights bf16, biases in the epilogue dtype."""
    w1, b1, w2, b2, w3, b3 = params
    epi = jnp.bfloat16 if bf16_epilogue else jnp.float32

    def pad2(a, rows, cols, dtype):
        return jnp.pad(a, ((0, rows - a.shape[0]),
                           (0, cols - a.shape[1]))).astype(dtype)

    w1p = pad2(w1, IN_PAD, H1P, jnp.bfloat16)    # (8, 384)
    b1p = pad2(b1, 1, H1P, epi)                  # (1, 384)
    w2p = pad2(w2, H1P, H2P, jnp.bfloat16)       # (384, 512)
    b2p = pad2(b2, 1, H2P, epi)                  # (1, 512)
    w3p = pad2(w3, H2P, OUT_DIM, jnp.bfloat16)   # (512, 2)
    b3p = b3.astype(jnp.float32)                 # (1, 2)
    return (w1p, b1p, w2p, b2p, w3p, b3p)


def _reference_forward(s, g, params, bf16_epilogue):
    """Plain-JAX reference following the same arithmetic path as the kernel."""
    w1, b1, w2, b2, w3, b3 = params
    epi = jnp.bfloat16 if bf16_epilogue else jnp.float32
    x = jnp.concatenate((s, g), axis=-1).astype(jnp.bfloat16)
    a1 = jnp.dot(x, w1.astype(jnp.bfloat16), preferred_element_type=jnp.float32)
    h1 = jnp.maximum(a1.astype(epi) + b1.astype(epi), 0).astype(jnp.bfloat16)
    a2 = jnp.dot(h1, w2.astype(jnp.bfloat16), preferred_element_type=jnp.float32)
    h2 = jnp.maximum(a2.astype(epi) + b2.astype(epi), 0).astype(jnp.bfloat16)
    return (jnp.dot(h2, w3.astype(jnp.bfloat16), preferred_element_type=jnp.float32)
            + b3.astype(jnp.float32))


if __name__ == "__main__":
    key = jax.random.PRNGKey(0)
    k_param, k_s, k_g = jax.random.split(key, 3)

    B = 8
    s = jax.random.normal(k_s, (B, IN_S), jnp.float32)   # cartpole state
    g = jax.random.normal(k_g, (B, IN_G), jnp.float32)   # goal
    h = None                                             # unused horizon arg

    bf16_epi = _bf16_epilogue_supported()
    params = init_params(k_param)
    kparams = pack_params(params, bf16_epi)

    logits = cartpole_policy_forward(s, g, h, kparams)
    logits = jax.block_until_ready(logits)

    ref = _reference_forward(s, g, params, bf16_epi)
    assert logits.shape == (B, OUT_DIM)
    assert jnp.allclose(logits, ref, atol=2e-2, rtol=2e-2), "mismatch vs reference"

    print("KERNEL_OK")
</pallas_src>

<mosaic_0001>
module attributes {stable_mosaic.version = 11 : i64} {
  func.func @_policy_kernel(%arg0: i32, %arg1: memref<16x8xbf16, #tpu.memory_space<vmem>>, %arg2: memref<8x384xbf16, #tpu.memory_space<vmem>>, %arg3: memref<1x384xbf16, #tpu.memory_space<vmem>>, %arg4: memref<384x512xbf16, #tpu.memory_space<vmem>>, %arg5: memref<1x512xbf16, #tpu.memory_space<vmem>>, %arg6: memref<512x2xbf16, #tpu.memory_space<vmem>>, %arg7: memref<1x2xf32, #tpu.memory_space<vmem>>, %arg8: memref<16x2xf32, #tpu.memory_space<vmem>>) attributes {dimension_semantics = [#tpu.dimension_semantics<parallel>], iteration_bounds = array<i64: 1>, scalar_prefetch = 0 : i64, scratch_operands = 0 : i64, tpu.core_type = #tpu.core_type<tc>, window_params = [{transform_indices = @transform_0, window_bounds = array<i64: 16, 8>}, {pipeline_mode = #tpu.pipeline_mode<synchronous>, transform_indices = @transform_1, window_bounds = array<i64: 8, 384>}, {pipeline_mode = #tpu.pipeline_mode<synchronous>, transform_indices = @transform_2, window_bounds = array<i64: 1, 384>}, {pipeline_mode = #tpu.pipeline_mode<synchronous>, transform_indices = @transform_3, window_bounds = array<i64: 384, 512>}, {pipeline_mode = #tpu.pipeline_mode<synchronous>, transform_indices = @transform_4, window_bounds = array<i64: 1, 512>}, {pipeline_mode = #tpu.pipeline_mode<synchronous>, transform_indices = @transform_5, window_bounds = array<i64: 512, 2>}, {pipeline_mode = #tpu.pipeline_mode<synchronous>, transform_indices = @transform_6, window_bounds = array<i64: 1, 2>}, {transform_indices = @transform_7, window_bounds = array<i64: 16, 2>}]} {
    %c0 = arith.constant 0 : index
    %c0_0 = arith.constant 0 : index
    %0 = vector.load %arg1[%c0, %c0_0] : memref<16x8xbf16, #tpu.memory_space<vmem>>, vector<16x8xbf16>
    %c0_1 = arith.constant 0 : index
    %c0_2 = arith.constant 0 : index
    %1 = vector.load %arg2[%c0_1, %c0_2] : memref<8x384xbf16, #tpu.memory_space<vmem>>, vector<8x384xbf16>
    %cst = arith.constant dense<0.000000e+00> : vector<16x384xf32>
    %2 = tpu.matmul %0, %1, %cst {dimension_numbers = #tpu.dot_dimension_numbers<[1], [0], [0], [1], [0, 0, 1, 1], [], []>} : vector<16x8xbf16>, vector<8x384xbf16>, vector<16x384xf32> -> vector<16x384xf32>
    %3 = arith.truncf %2 : vector<16x384xf32> to vector<16x384xbf16>
    %c0_3 = arith.constant 0 : index
    %c0_4 = arith.constant 0 : index
    %4 = vector.load %arg3[%c0_3, %c0_4] : memref<1x384xbf16, #tpu.memory_space<vmem>>, vector<1x384xbf16>
    %5 = vector.broadcast %4 : vector<1x384xbf16> to vector<16x384xbf16>
    %6 = arith.addf %3, %5 : vector<16x384xbf16>
    %cst_5 = arith.constant 0.000000e+00 : bf16
    %7 = vector.broadcast %cst_5 : bf16 to vector<16x384xbf16>
    %8 = arith.maximumf %6, %7 : vector<16x384xbf16>
    %c0_6 = arith.constant 0 : index
    %c0_7 = arith.constant 0 : index
    %9 = vector.load %arg4[%c0_6, %c0_7] : memref<384x512xbf16, #tpu.memory_space<vmem>>, vector<384x512xbf16>
    %cst_8 = arith.constant dense<0.000000e+00> : vector<16x512xf32>
    %10 = tpu.matmul %8, %9, %cst_8 {dimension_numbers = #tpu.dot_dimension_numbers<[1], [0], [0], [1], [0, 0, 1, 1], [], []>} : vector<16x384xbf16>, vector<384x512xbf16>, vector<16x512xf32> -> vector<16x512xf32>
    %11 = arith.truncf %10 : vector<16x512xf32> to vector<16x512xbf16>
    %c0_9 = arith.constant 0 : index
    %c0_10 = arith.constant 0 : index
    %12 = vector.load %arg5[%c0_9, %c0_10] : memref<1x512xbf16, #tpu.memory_space<vmem>>, vector<1x512xbf16>
    %13 = vector.broadcast %12 : vector<1x512xbf16> to vector<16x512xbf16>
    %14 = arith.addf %11, %13 : vector<16x512xbf16>
    %cst_11 = arith.constant 0.000000e+00 : bf16
    %15 = vector.broadcast %cst_11 : bf16 to vector<16x512xbf16>
    %16 = arith.maximumf %14, %15 : vector<16x512xbf16>
    %c0_12 = arith.constant 0 : index
    %c0_13 = arith.constant 0 : index
    %17 = vector.load %arg6[%c0_12, %c0_13] : memref<512x2xbf16, #tpu.memory_space<vmem>>, vector<512x2xbf16>
    %cst_14 = arith.constant dense<0.000000e+00> : vector<16x2xf32>
    %18 = tpu.matmul %16, %17, %cst_14 {dimension_numbers = #tpu.dot_dimension_numbers<[1], [0], [0], [1], [0, 0, 1, 1], [], []>} : vector<16x512xbf16>, vector<512x2xbf16>, vector<16x2xf32> -> vector<16x2xf32>
    %c0_15 = arith.constant 0 : index
    %c0_16 = arith.constant 0 : index
    %19 = vector.load %arg7[%c0_15, %c0_16] : memref<1x2xf32, #tpu.memory_space<vmem>>, vector<1x2xf32>
    %20 = vector.broadcast %19 : vector<1x2xf32> to vector<16x2xf32>
    %21 = arith.addf %18, %20 : vector<16x2xf32>
    %c0_17 = arith.constant 0 : index
    %c0_18 = arith.constant 0 : index
    %22 = vector.load %arg8[%c0_17, %c0_18] : memref<16x2xf32, #tpu.memory_space<vmem>>, vector<16x2xf32>
    tpu.vector_store %arg8[%c0_17, %c0_18], %21 {strides = array<i32>} : memref<16x2xf32, #tpu.memory_space<vmem>>, vector<16x2xf32>,
    return
  }
  func.func @transform_0(%arg0: i32) -> (i32, i32) {
    %c0_i32 = arith.constant 0 : i32
    %c0_i32_0 = arith.constant 0 : i32
    return %arg0, %c0_i32 : i32, i32
  }
  func.func @transform_1(%arg0: i32) -> (i32, i32) {
    %c0_i32 = arith.constant 0 : i32
    %c0_i32_0 = arith.constant 0 : i32
    %c0_i32_1 = arith.constant 0 : i32
    return %c0_i32, %c0_i32_0 : i32, i32
  }
  func.func @transform_2(%arg0: i32) -> (i32, i32) {
    %c0_i32 = arith.constant 0 : i32
    %c0_i32_0 = arith.constant 0 : i32
    %c0_i32_1 = arith.constant 0 : i32
    return %c0_i32, %c0_i32_0 : i32, i32
  }
  func.func @transform_3(%arg0: i32) -> (i32, i32) {
    %c0_i32 = arith.constant 0 : i32
    %c0_i32_0 = arith.constant 0 : i32
    %c0_i32_1 = arith.constant 0 : i32
    return %c0_i32, %c0_i32_0 : i32, i32
  }
  func.func @transform_4(%arg0: i32) -> (i32, i32) {
    %c0_i32 = arith.constant 0 : i32
    %c0_i32_0 = arith.constant 0 : i32
    %c0_i32_1 = arith.constant 0 : i32
    return %c0_i32, %c0_i32_0 : i32, i32
  }
  func.func @transform_5(%arg0: i32) -> (i32, i32) {
    %c0_i32 = arith.constant 0 : i32
    %c0_i32_0 = arith.constant 0 : i32
    %c0_i32_1 = arith.constant 0 : i32
    return %c0_i32, %c0_i32_0 : i32, i32
  }
  func.func @transform_6(%arg0: i32) -> (i32, i32) {
    %c0_i32 = arith.constant 0 : i32
    %c0_i32_0 = arith.constant 0 : i32
    %c0_i32_1 = arith.constant 0 : i32
    return %c0_i32, %c0_i32_0 : i32, i32
  }
  func.func @transform_7(%arg0: i32) -> (i32, i32) {
    %c0_i32 = arith.constant 0 : i32
    %c0_i32_0 = arith.constant 0 : i32
    return %arg0, %c0_i32 : i32, i32
  }
}

</mosaic_0001>

<bundles_post_ra>
// kernel: tpu_custom_call.1
= control target key start
LH: loop header
LB: loop body
LE: loop exit
PB: predicated region body
PF: predicated region fallthrough
CT: control target
= control target key end

     0   :  { %12 = vsyncpa [#allocation3], 0  ;;  %s1982_s27 = smov [#allocation2]   ;;  %s1983_s29 = smov 256   ;;  %s2172_s0 = inlined_call_operand.vmem [shape: bf16[16,8], index: 0, kind: input, shape index: {}]   ;;  %s2173_s1 = inlined_call_operand.vmem [shape: bf16[8,384], index: 1, kind: input, shape index: {}]   ;;  %s2174_s2 = inlined_call_operand.vmem [shape: bf16[1,384], index: 2, kind: input, shape index: {}]   ;;  %s2175_s3 = inlined_call_operand.hbm [shape: bf16[384,512], index: 3, kind: input, shape index: {}]   ;;  %s2176_s4 = inlined_call_operand.vmem [shape: bf16[1,512], index: 4, kind: input, shape index: {}]   ;;  %s2177_s5 = inlined_call_operand.vmem [shape: bf16[512,2], index: 5, kind: input, shape index: {}]   ;;  %s2178_s6 = inlined_call_operand.vmem [shape: f32[1,2], index: 6, kind: input, shape index: {}]   ;;  %s2179_s7 = inlined_call_operand.vmem [shape: f32[16,2], index: 7, kind: output, shape index: {}]  }
   0x1   :  { %s23_s26 = sshll.u32 %s2175_s3, 4  ;;  %s25_s28 = sshll.u32 %s1982_s27, 4  ;;  %s24_s26 = int_to_ptr.hbm [resolvable:$true] %s23_s26  ;;  %s26_s28 = int_to_ptr.vmem [resolvable:$true] %s25_s28 }
   0x2   :  { %s1984_s30 = smov 16  }
   0x3   :  { %31 = dma.hbm_to_vmem [thread:$0]  %s24_s26, 12288, %s26_s28, [#allocation3], %s1983_s29, %s1983_s29, %s1984_s30  }
   0x4   :  { %1980 = dma.done.wait [#allocation3], 12288  }
   0x5   :  { %1981 = vsyncadd [#allocation3], 4294955008  ;;  %v45_v0 = vld [vmem:[%s2173_s1] sm:$0xff]  ;;  %vm64_vm0 = vcmask 1043456   ;;  %v46_v1 = vld [vmem:[%s2173_s1 + $0x8] sm:$0xf] }
   0x6   :  { %vm60_vm1 = vcmask 64512   ;;  %v54_v2 = vunpack.c.l.b16 %v45_v0  ;;  %v55_v3 = vunpack.c.h.b16 %v45_v0  ;;  %v56_v4 = vunpack.c.l.b16 %v46_v1  ;;  %v1425_v5 = vld [vmem:[#allocation2 + $0xe0] sm:$0xf]  ;;  %v1854_v6 = vld [vmem:[#allocation2 + $0xec] sm:$0xf0]  ;;  %v1823_v27 = vld [vmem:[%s2172_s0] sm:$0xff] }
   0x7   :  { %v1553_v7 = vld [vmem:[#allocation2 + $0x1e0] sm:$0xf]  ;;  %v1426_v8 = vor.u32 %v1854_v6, %v1425_v5  ;;  %v1886_v9 = vld [vmem:[#allocation2 + $0x1ec] sm:$0xf0]  ;;  %v1852_v10 = vld [vmem:[#allocation2 + $0xe4] sm:$0xf] }
   0x8   :  { %v1427_v11 = vld [vmem:[#allocation2 + $0xf0] sm:$0xf0]  ;;  %v57_v12 = vpack.c.b16 %v54_v2, %v54_v2  ;;  %v58_v13 = vpack.c.b16 %v55_v3, %v55_v3  ;;  %v59_v14 = vpack.c.b16 %v56_v4, %v56_v4  ;;  %v1554_v15 = vor.u32 %v1886_v9, %v1553_v7  ;;  %v1409_v16 = vld [vmem:[#allocation2 + $0xc0] sm:$0xf]  ;;  %v1850_v17 = vld [vmem:[#allocation2 + $0xcc] sm:$0xf0] }
   0x9   :  { %v1537_v18 = vld [vmem:[#allocation2 + $0x1c0] sm:$0xf]  ;;  %745 = vmatpush.bf16.msra.mxu3 %v1426_v8  ;;  %v1430_v19 = vor.u32 %v1852_v10, %v1427_v11  ;;  %v1410_v20 = vor.u32 %v1850_v17, %v1409_v16  ;;  %v1882_v21 = vld [vmem:[#allocation2 + $0x1cc] sm:$0xf0]  ;;  %v1848_v22 = vld [vmem:[#allocation2 + $0xc4] sm:$0xf] }
   0xa   :  { %v1411_v23 = vld [vmem:[#allocation2 + $0xd0] sm:$0xf0]  ;;  %v66_v24 = vsel %vm64_vm0, %v57_v12, 0  ;;  %v69_v25 = vsel %vm64_vm0, %v58_v13, 0  ;;  %v72_v26 = vsel %vm64_vm0, %v59_v14, 0  ;;  %v1538_v32 = vor.u32 %v1882_v21, %v1537_v18 }
   0xb   :  { %v1681_v28 = vld [vmem:[#allocation2 + $0x2e0] sm:$0xf]  ;;  %81 = vmatpush.bf16.msra.mxu0 %v66_v24  ;;  %95 = vmatpush.bf16.msra.mxu1 %v69_v25  ;;  %v1918_v29 = vld [vmem:[#allocation2 + $0x2ec] sm:$0xf0]  ;;  %v1414_v36 = vor.u32 %v1848_v22, %v1411_v23  ;;  %v1844_v38 = vld [vmem:[#allocation2 + $0xa4] sm:$0xf] }
   0xc   :  { %v1393_v30 = vld [vmem:[#allocation2 + $0xa0] sm:$0xf]  ;;  %v1846_v31 = vld [vmem:[#allocation2 + $0xac] sm:$0xf0]  ;;  %109 = vmatpush.bf16.msra.mxu2 %v72_v26  ;;  %v1682_v33 = vor.u32 %v1918_v29, %v1681_v28  ;;  %v1395_v41 = vld [vmem:[#allocation2 + $0xb0] sm:$0xf0] }
   0xd   :  { %v1521_v34 = vld [vmem:[#allocation2 + $0x1a0] sm:$0xf]  ;;  %v1878_v35 = vld [vmem:[#allocation2 + $0x1ac] sm:$0xf0]  ;;  %746 = vmatpush.bf16.msra.mxu3 %v1410_v20  ;;  %v1394_v37 = vor.u32 %v1846_v31, %v1393_v30  ;;  %v1398_v48 = vor.u32 %v1844_v38, %v1395_v41  ;;  %v1840_v52 = vld [vmem:[#allocation2 + $0x84] sm:$0xf] }
   0xe   :  { %v1665_v39 = vld [vmem:[#allocation2 + $0x2c0] sm:$0xf]  ;;  %v1914_v40 = vld [vmem:[#allocation2 + $0x2cc] sm:$0xf0]  ;;  %1308 = vmatmul.msk.bf16.vlgmr.msra.gmra.mxu0 %vm60_vm1, %v1823_v27  ;;  %1309 = vmatmul.msk.bf16.vlgmr.msra.gmra.mxu1 %vm60_vm1, %v1823_v27  ;;  %v1522_v45 = vor.u32 %v1878_v35, %v1521_v34  ;;  %v1379_v53 = vld [vmem:[#allocation2 + $0x90] sm:$0xf0] }
   0xf   :  { %759 = vmatpush.bf16.msrb.mxu0 %v1554_v15  ;;  %v1377_v42 = vld [vmem:[#allocation2 + $0x80] sm:$0xf]  ;;  %v1842_v43 = vld [vmem:[#allocation2 + $0x8c] sm:$0xf0]  ;;  %1310 = vmatmul.msk.bf16.vlgmr.msra.gmra.mxu2 %vm60_vm1, %v1823_v27  ;;  %v1666_v44 = vor.u32 %v1914_v40, %v1665_v39  ;;  %v1382_v60 = vor.u32 %v1840_v52, %v1379_v53  ;;  %v1836_v0 = vld [vmem:[#allocation2 + $0x64] sm:$0xf] }
  0x10   :  { %787 = vmatpush.bf16.msrb.mxu2 %v1430_v19  ;;  %773 = vmatpush.bf16.msrb.mxu1 %v1682_v33  ;;  %v1649_v46 = vld [vmem:[#allocation2 + $0x2a0] sm:$0xf]  ;;  %v1910_v47 = vld [vmem:[#allocation2 + $0x2ac] sm:$0xf0]  ;;  %v1378_v49 = vor.u32 %v1842_v43, %v1377_v42  ;;  %v1363_v1 = vld [vmem:[#allocation2 + $0x70] sm:$0xf0] }
  0x11   :  { %747 = vmatpush.bf16.msra.mxu3 %v1394_v37  ;;  %v1505_v50 = vld [vmem:[#allocation2 + $0x180] sm:$0xf]  ;;  %v1874_v51 = vld [vmem:[#allocation2 + $0x18c] sm:$0xf0]  ;;  %v1650_v56 = vor.u32 %v1910_v47, %v1649_v46  ;;  %v1366_v8 = vor.u32 %v1836_v0, %v1363_v1  ;;  %v1832_v12 = vld [vmem:[#allocation2 + $0x44] sm:$0xf] }
  0x12   :  { %v1361_v54 = vld [vmem:[#allocation2 + $0x60] sm:$0xf]  ;;  %v1838_v55 = vld [vmem:[#allocation2 + $0x6c] sm:$0xf0]  ;;  %v1506_v57 = vor.u32 %v1874_v51, %v1505_v50  ;;  %v1347_v13 = vld [vmem:[#allocation2 + $0x50] sm:$0xf0] }
  0x13   :  { %760 = vmatpush.bf16.msrb.mxu0 %v1538_v32  ;;  %v1633_v58 = vld [vmem:[#allocation2 + $0x280] sm:$0xf]  ;;  %v1906_v59 = vld [vmem:[#allocation2 + $0x28c] sm:$0xf0]  ;;  %v1362_v61 = vor.u32 %v1838_v55, %v1361_v54  ;;  %v1350_v20 = vor.u32 %v1832_v12, %v1347_v13  ;;  %v1828_v24 = vld [vmem:[#allocation2 + $0x24] sm:$0xf] }
  0x14   :  { %788 = vmatpush.bf16.msrb.mxu2 %v1414_v36  ;;  %774 = vmatpush.bf16.msrb.mxu1 %v1666_v44  ;;  %v1489_v62 = vld [vmem:[#allocation2 + $0x160] sm:$0xf]  ;;  %v1870_v63 = vld [vmem:[#allocation2 + $0x16c] sm:$0xf0]  ;;  %v1634_v4 = vor.u32 %v1906_v59, %v1633_v58  ;;  %v1331_v25 = vld [vmem:[#allocation2 + $0x30] sm:$0xf0] }
  0x15   :  { %748 = vmatpush.bf16.msra.mxu3 %v1378_v49  ;;  %v1345_v2 = vld [vmem:[#allocation2 + $0x40] sm:$0xf]  ;;  %v1834_v3 = vld [vmem:[#allocation2 + $0x4c] sm:$0xf0]  ;;  %v1490_v5 = vor.u32 %v1870_v63, %v1489_v62  ;;  %v1884_v30 = vld [vmem:[#allocation2 + $0x1e4] sm:$0xf]  ;;  %v1334_v36 = vor.u32 %v1828_v24, %v1331_v25 }
  0x16   :  { %v1617_v6 = vld [vmem:[#allocation2 + $0x260] sm:$0xf]  ;;  %v1902_v7 = vld [vmem:[#allocation2 + $0x26c] sm:$0xf0]  ;;  %v1346_v9 = vor.u32 %v1834_v3, %v1345_v2  ;;  %v1555_v31 = vld [vmem:[#allocation2 + $0x1f0] sm:$0xf0] }
  0x17   :  { %761 = vmatpush.bf16.msrb.mxu0 %v1522_v45  ;;  %v1473_v10 = vld [vmem:[#allocation2 + $0x140] sm:$0xf]  ;;  %v1866_v11 = vld [vmem:[#allocation2 + $0x14c] sm:$0xf0]  ;;  %v1618_v16 = vor.u32 %v1902_v7, %v1617_v6  ;;  %v1824_v38 = vld [vmem:[#allocation2 + $0x4] sm:$0xf]  ;;  %v1558_v41 = vor.u32 %v1884_v30, %v1555_v31 }
  0x18   :  { %789 = vmatpush.bf16.msrb.mxu2 %v1398_v48  ;;  %775 = vmatpush.bf16.msrb.mxu1 %v1650_v56  ;;  %v1329_v14 = vld [vmem:[#allocation2 + $0x20] sm:$0xf]  ;;  %v1830_v15 = vld [vmem:[#allocation2 + $0x2c] sm:$0xf0]  ;;  %v1474_v17 = vor.u32 %v1866_v11, %v1473_v10  ;;  %v1315_v39 = vld [vmem:[#allocation2 + $0x10] sm:$0xf0] }
  0x19   :  { %749 = vmatpush.bf16.msra.mxu3 %v1362_v61  ;;  %v1601_v18 = vld [vmem:[#allocation2 + $0x240] sm:$0xf]  ;;  %v1898_v19 = vld [vmem:[#allocation2 + $0x24c] sm:$0xf0]  ;;  %v1330_v21 = vor.u32 %v1830_v15, %v1329_v14  ;;  %v1916_v40 = vld [vmem:[#allocation2 + $0x2e4] sm:$0xf]  ;;  %v1318_v51 = vor.u32 %v1824_v38, %v1315_v39 }
  0x1a   :  { %v1457_v22 = vld [vmem:[#allocation2 + $0x120] sm:$0xf]  ;;  %v1862_v23 = vld [vmem:[#allocation2 + $0x12c] sm:$0xf0]  ;;  %v1602_v28 = vor.u32 %v1898_v19, %v1601_v18  ;;  %v1683_v42 = vld [vmem:[#allocation2 + $0x2f0] sm:$0xf0] }
  0x1b   :  { %762 = vmatpush.bf16.msrb.mxu0 %v1506_v57  ;;  %v1313_v26 = vld [vmem:[#allocation2] sm:$0xf]  ;;  %v1826_v27 = vld [vmem:[#allocation2 + $0xc] sm:$0xf0]  ;;  %v1458_v32 = vor.u32 %v1862_v23, %v1457_v22  ;;  %v1561_v43 = vld [vmem:[#allocation2 + $0x1e8] sm:$0xf]  ;;  %v1686_v52 = vor.u32 %v1916_v40, %v1683_v42 }
  0x1c   :  { %790 = vmatpush.bf16.msrb.mxu2 %v1382_v60  ;;  %776 = vmatpush.bf16.msrb.mxu1 %v1634_v4  ;;  %v1441_v29 = vld [vmem:[#allocation2 + $0x100] sm:$0xf]  ;;  %v1858_v33 = vld [vmem:[#allocation2 + $0x10c] sm:$0xf0]  ;;  %v1314_v37 = vor.u32 %v1826_v27, %v1313_v26  ;;  %v1887_v44 = vld [vmem:[#allocation2 + $0x1f4] sm:$0xf0] }
  0x1d   :  { %750 = vmatpush.bf16.msra.mxu3 %v1346_v9  ;;  %v1585_v34 = vld [vmem:[#allocation2 + $0x220] sm:$0xf]  ;;  %v1894_v35 = vld [vmem:[#allocation2 + $0x22c] sm:$0xf0]  ;;  %v1880_v46 = vld [vmem:[#allocation2 + $0x1c4] sm:$0xf]  ;;  %v1442_v48 = vor.u32 %v1858_v33, %v1441_v29  ;;  %v1562_v55 = vor.u32 %v1887_v44, %v1561_v43 }
  0x1e   :  { %v1586_v45 = vor.u32 %v1894_v35, %v1585_v34  ;;  %v1539_v47 = vld [vmem:[#allocation2 + $0x1d0] sm:$0xf0]  ;;  %v1569_v49 = vld [vmem:[#allocation2 + $0x200] sm:$0xf]  ;;  %v1890_v50 = vld [vmem:[#allocation2 + $0x20c] sm:$0xf0] }
  0x1f   :  { %763 = vmatpush.bf16.msrb.mxu0 %v1490_v5  ;;  %v1433_v53 = vld [vmem:[#allocation2 + $0xe8] sm:$0xf]  ;;  %v1855_v54 = vld [vmem:[#allocation2 + $0xf4] sm:$0xf0]  ;;  %v1542_v56 = vor.u32 %v1880_v46, %v1539_v47  ;;  %v1912_v57 = vld [vmem:[#allocation2 + $0x2c4] sm:$0xf]  ;;  %v1570_v61 = vor.u32 %v1890_v50, %v1569_v49 }
  0x20   :  { %791 = vmatpush.bf16.msrb.mxu2 %v1366_v8  ;;  %777 = vmatpush.bf16.msrb.mxu1 %v1618_v16  ;;  %v1667_v58 = vld [vmem:[#allocation2 + $0x2d0] sm:$0xf0]  ;;  %v1545_v59 = vld [vmem:[#allocation2 + $0x1c8] sm:$0xf]  ;;  %v1883_v60 = vld [vmem:[#allocation2 + $0x1d4] sm:$0xf0]  ;;  %v1434_v0 = vor.u32 %v1855_v54, %v1433_v53 }
  0x21   :  { %751 = vmatpush.bf16.msra.mxu3 %v1330_v21  ;;  %v1876_v62 = vld [vmem:[#allocation2 + $0x1a4] sm:$0xf]  ;;  %v1523_v63 = vld [vmem:[#allocation2 + $0x1b0] sm:$0xf0]  ;;  %v1670_v1 = vor.u32 %v1912_v57, %v1667_v58  ;;  %v1546_v2 = vor.u32 %v1883_v60, %v1545_v59  ;;  %v1529_v6 = vld [vmem:[#allocation2 + $0x1a8] sm:$0xf] }
  0x22   :  { %v1526_v3 = vor.u32 %v1876_v62, %v1523_v63  ;;  %v1908_v4 = vld [vmem:[#allocation2 + $0x2a4] sm:$0xf]  ;;  %v1651_v5 = vld [vmem:[#allocation2 + $0x2b0] sm:$0xf0]  ;;  %v1879_v7 = vld [vmem:[#allocation2 + $0x1b4] sm:$0xf0] }
  0x23   :  { %764 = vmatpush.bf16.msrb.mxu0 %v1474_v17  ;;  %v1654_v8 = vor.u32 %v1908_v4, %v1651_v5  ;;  %v1530_v9 = vor.u32 %v1879_v7, %v1529_v6  ;;  %v120_v10 = vld [vmem:[%s2174_s2] sm:$0x7]  ;;  %v1417_v11 = vld [vmem:[#allocation2 + $0xc8] sm:$0xf]  ;;  %v1872_v14 = vld [vmem:[#allocation2 + $0x184] sm:$0xf] }
  0x24   :  { %792 = vmatpush.bf16.msrb.mxu2 %v1350_v20  ;;  %778 = vmatpush.bf16.msrb.mxu1 %v1602_v28  ;;  %122 = vst [vmem:[#allocation1] ss:$9 sm:$0xff] %v120_v10  ;;  %v1851_v12 = vld [vmem:[#allocation2 + $0xd4] sm:$0xf0]  ;;  %v1507_v15 = vld [vmem:[#allocation2 + $0x190] sm:$0xf0] }
  0x25   :  { %752 = vmatpush.bf16.msra.mxu3 %v1314_v37  ;;  %v1418_v13 = vor.u32 %v1851_v12, %v1417_v11  ;;  %v1904_v16 = vld [vmem:[#allocation2 + $0x284] sm:$0xf]  ;;  %v1635_v17 = vld [vmem:[#allocation2 + $0x290] sm:$0xf0]  ;;  %v1510_v18 = vor.u32 %v1872_v14, %v1507_v15  ;;  %v1513_v20 = vld [vmem:[#allocation2 + $0x188] sm:$0xf] }
  0x26   :  { %v1638_v19 = vor.u32 %v1904_v16, %v1635_v17  ;;  %v1875_v21 = vld [vmem:[#allocation2 + $0x194] sm:$0xf0]  ;;  %v1401_v22 = vld [vmem:[#allocation2 + $0xa8] sm:$0xf]  ;;  %v1868_v26 = vld [vmem:[#allocation2 + $0x164] sm:$0xf] }
  0x27   :  { %765 = vmatpush.bf16.msrb.mxu0 %v1458_v32  ;;  %v1514_v23 = vor.u32 %v1875_v21, %v1513_v20  ;;  %v1847_v24 = vld [vmem:[#allocation2 + $0xb4] sm:$0xf0]  ;;  %v1491_v27 = vld [vmem:[#allocation2 + $0x170] sm:$0xf0]  ;;  %v1900_v29 = vld [vmem:[#allocation2 + $0x264] sm:$0xf] }
  0x28   :  { %793 = vmatpush.bf16.msrb.mxu2 %v1334_v36  ;;  %779 = vmatpush.bf16.msrb.mxu1 %v1586_v45  ;;  %v1402_v25 = vor.u32 %v1847_v24, %v1401_v22  ;;  %v1494_v28 = vor.u32 %v1868_v26, %v1491_v27  ;;  %v1619_v30 = vld [vmem:[#allocation2 + $0x270] sm:$0xf0]  ;;  %v1497_v31 = vld [vmem:[#allocation2 + $0x168] sm:$0xf]  ;;  %v1871_v33 = vld [vmem:[#allocation2 + $0x174] sm:$0xf0] }
  0x29   :  { %801 = vmatpush.bf16.msrb.mxu3 %v1558_v41  ;;  %v1622_v32 = vor.u32 %v1900_v29, %v1619_v30  ;;  %v1385_v34 = vld [vmem:[#allocation2 + $0x88] sm:$0xf]  ;;  %v1843_v35 = vld [vmem:[#allocation2 + $0x94] sm:$0xf0]  ;;  %v1498_v36 = vor.u32 %v1871_v33, %v1497_v31  ;;  %v1864_v38 = vld [vmem:[#allocation2 + $0x144] sm:$0xf] }
  0x2a   :  { %v1386_v37 = vor.u32 %v1843_v35, %v1385_v34  ;;  %v1475_v39 = vld [vmem:[#allocation2 + $0x150] sm:$0xf0]  ;;  %v1896_v40 = vld [vmem:[#allocation2 + $0x244] sm:$0xf]  ;;  %v1481_v43 = vld [vmem:[#allocation2 + $0x148] sm:$0xf] }
  0x2b   :  { %766 = vmatpush.bf16.msrb.mxu0 %v1442_v48  ;;  %v1478_v41 = vor.u32 %v1864_v38, %v1475_v39  ;;  %v1603_v42 = vld [vmem:[#allocation2 + $0x250] sm:$0xf0]  ;;  %v1867_v44 = vld [vmem:[#allocation2 + $0x154] sm:$0xf0]  ;;  %v1369_v47 = vld [vmem:[#allocation2 + $0x68] sm:$0xf] }
  0x2c   :  { %794 = vmatpush.bf16.msrb.mxu2 %v1318_v51  ;;  %780 = vmatpush.bf16.msrb.mxu1 %v1570_v61  ;;  %v1606_v45 = vor.u32 %v1896_v40, %v1603_v42  ;;  %v1482_v46 = vor.u32 %v1867_v44, %v1481_v43  ;;  %v1839_v48 = vld [vmem:[#allocation2 + $0x74] sm:$0xf0]  ;;  %v124_v50 = vld [vmem:[#allocation1 + $0x9] sm:$0xff]  ;;  %v125_v51 = vld [vmem:[#allocation1 + $0x12] sm:$0xff]  ;;  %vm1296_vm2 = vcmask 15360  }
  0x2d   :  { %802 = vmatpush.bf16.msrb.mxu3 %v1542_v56  ;;  %v123_v49 = vld [vmem:[#allocation1] sm:$0xff]  ;;  %v1860_v53 = vld [vmem:[#allocation2 + $0x124] sm:$0xf]  ;;  %v1459_v54 = vld [vmem:[#allocation2 + $0x130] sm:$0xf0]  ;;  %v132_v24 = vpack.i.b16 %v125_v51, %v125_v51 }
  0x2e   :  { %v917_v56 = vld [vmem:[%s2176_s4] sm:$0xf]  ;;  %v1462_v57 = vor.u32 %v1860_v53, %v1459_v54  ;;  %v1587_v58 = vld [vmem:[#allocation2 + $0x230] sm:$0xf0]  ;;  %v1465_v59 = vld [vmem:[#allocation2 + $0x128] sm:$0xf]  ;;  %v126_v17 = vpack.i.b16 %v123_v49, %v123_v49 }
  0x2f   :  { %815 = vmatpush.bf16.msra.mxu0 %v1686_v52  ;;  %v1370_v52 = vor.u32 %v1839_v48, %v1369_v47  ;;  %919 = vst [vmem:[#allocation1] ss:$9 sm:$0xff] %v917_v56  ;;  %v1863_v61 = vld [vmem:[#allocation2 + $0x134] sm:$0xf0]  ;;  %v1353_v62 = vld [vmem:[#allocation2 + $0x48] sm:$0xf] }
  0x30   :  { %843 = vmatpush.bf16.msra.mxu2 %v1562_v55  ;;  %829 = vmatpush.bf16.msra.mxu1 %v1434_v0  ;;  %v1892_v55 = vld [vmem:[#allocation2 + $0x224] sm:$0xf]  ;;  %v1466_v63 = vor.u32 %v1863_v61, %v1465_v59  ;;  %v1835_v0 = vld [vmem:[#allocation2 + $0x54] sm:$0xf0]  ;;  %v1571_v6 = vld [vmem:[#allocation2 + $0x210] sm:$0xf0] }
  0x31   :  { %803 = vmatpush.bf16.msrb.mxu3 %v1526_v3  ;;  %v1590_v60 = vor.u32 %v1892_v55, %v1587_v58  ;;  %v1443_v3 = vld [vmem:[#allocation2 + $0x110] sm:$0xf0]  ;;  %v1888_v4 = vld [vmem:[#allocation2 + $0x204] sm:$0xf]  ;;  %v1449_v7 = vld [vmem:[#allocation2 + $0x108] sm:$0xf] }
  0x32   :  { %v1337_v11 = vld [vmem:[#allocation2 + $0x28] sm:$0xf]  ;;  %v1831_v12 = vld [vmem:[#allocation2 + $0x34] sm:$0xf0]  ;;  %v128_v22 = vperm.slane %v126_v17, 0  ;;  %v134_v34 = vperm.slane %v132_v24, 0 }
  0x33   :  { %816 = vmatpush.bf16.msra.mxu0 %v1670_v1  ;;  %v1354_v1 = vor.u32 %v1835_v0, %v1353_v62  ;;  %v1321_v14 = vld [vmem:[#allocation2 + $0x8] sm:$0xf]  ;;  %v1827_v15 = vld [vmem:[#allocation2 + $0x14] sm:$0xf0]  ;;  %v1853_v43 = vld [vmem:[#allocation2 + $0xec] sm:$0xf] }
  0x34   :  { %844 = vmatpush.bf16.msra.mxu2 %v1546_v2  ;;  %830 = vmatpush.bf16.msra.mxu1 %v1418_v13  ;;  %v1856_v2 = vld [vmem:[#allocation2 + $0x104] sm:$0xf]  ;;  %v1338_v13 = vor.u32 %v1831_v12, %v1337_v11  ;;  %v1322_v16 = vor.u32 %v1827_v15, %v1321_v14  ;;  %v141_v27 = vunpack.c.l.bf16 %v128_v22  ;;  %v1919_v42 = vld [vmem:[#allocation2 + $0x2f4] sm:$0xf0]  ;;  %v1917_v47 = vld [vmem:[#allocation2 + $0x2ec] sm:$0xf] }
  0x35   :  { %804 = vmatpush.bf16.msrb.mxu3 %v1510_v18  ;;  %v1446_v5 = vor.u32 %v1856_v2, %v1443_v3  ;;  %v129_v18 = vpack.i.b16 %v124_v50, %v124_v50  ;;  %v1691_v48 = vld [vmem:[#allocation2 + $0x2f8] sm:$0xf0]  ;;  %v1915_v61 = vld [vmem:[#allocation2 + $0x2d4] sm:$0xf0]  ;;  %v1849_v62 = vld [vmem:[#allocation2 + $0xcc] sm:$0xf] }
  0x36   :  { %v1694_v59 = vor.u32 %v1917_v47, %v1691_v48  ;;  %v1913_v2 = vld [vmem:[#allocation2 + $0x2cc] sm:$0xf]  ;;  %v1675_v3 = vld [vmem:[#allocation2 + $0x2d8] sm:$0xf0]  ;;  %v1911_v11 = vld [vmem:[#allocation2 + $0x2b4] sm:$0xf0] }
  0x37   :  { %817 = vmatpush.bf16.msra.mxu0 %v1654_v8  ;;  %v1859_v8 = vld [vmem:[#allocation2 + $0x114] sm:$0xf0]  ;;  %v1845_v12 = vld [vmem:[#allocation2 + $0xac] sm:$0xf]  ;;  %v1659_v17 = vld [vmem:[#allocation2 + $0x2b8] sm:$0xf0] }
  0x38   :  { %845 = vmatpush.bf16.msra.mxu2 %v1530_v9  ;;  %831 = vmatpush.bf16.msra.mxu1 %v1402_v25  ;;  %v1574_v9 = vor.u32 %v1888_v4, %v1571_v6  ;;  %v1450_v10 = vor.u32 %v1859_v8, %v1449_v7  ;;  %v1885_v6 = vld [vmem:[#allocation2 + $0x1ec] sm:$0xf]  ;;  %v1563_v7 = vld [vmem:[#allocation2 + $0x1f8] sm:$0xf0]  ;;  %v1657_v8 = vld [vmem:[#allocation2 + $0x2a8] sm:$0xf] }
  0x39   :  { %805 = vmatpush.bf16.msrb.mxu3 %v1494_v28  ;;  %v1547_v22 = vld [vmem:[#allocation2 + $0x1d8] sm:$0xf0]  ;;  %v1609_v48 = vld [vmem:[#allocation2 + $0x248] sm:$0xf] }
  0x3b   :  { %818 = vmatpush.bf16.msra.mxu0 %v1638_v19 }
  0x3c   :  { %846 = vmatpush.bf16.msra.mxu2 %v1514_v23  ;;  %832 = vmatpush.bf16.msra.mxu1 %v1386_v37  ;;  %v131_v23 = vperm.slane %v129_v18, 0  ;;  %v1566_v18 = vor.u32 %v1885_v6, %v1563_v7  ;;  %v1865_v6 = vld [vmem:[#allocation2 + $0x14c] sm:$0xf]  ;;  %v1483_v7 = vld [vmem:[#allocation2 + $0x158] sm:$0xf0] }
  0x3d   :  { %806 = vmatpush.bf16.msrb.mxu3 %v1478_v41  ;;  %v1689_v41 = vld [vmem:[#allocation2 + $0x2e8] sm:$0xf] }
  0x3e   :  { %v142_v28 = vunpack.c.l.bf16 %v131_v23  ;;  %v1690_v55 = vor.u32 %v1919_v42, %v1689_v41  ;;  %v1901_v42 = vld [vmem:[#allocation2 + $0x26c] sm:$0xf] }
  0x3f   :  { %819 = vmatpush.bf16.msra.mxu0 %v1622_v32 }
  0x40   :  { %847 = vmatpush.bf16.msra.mxu2 %v1498_v36  ;;  %833 = vmatpush.bf16.msra.mxu1 %v1370_v52 }
  0x41   :  { %807 = vmatpush.bf16.msrb.mxu3 %v1462_v57 }
  0x43   :  { %820 = vmatpush.bf16.msra.mxu0 %v1606_v45  ;;  %v143_v45 = vunpack.c.l.bf16 %v134_v34  ;;  %v1531_v34 = vld [vmem:[#allocation2 + $0x1b8] sm:$0xf0] }
  0x44   :  { %848 = vmatpush.bf16.msra.mxu2 %v1482_v46  ;;  %834 = vmatpush.bf16.msra.mxu1 %v1354_v1  ;;  %v1435_v46 = vld [vmem:[#allocation2 + $0xf8] sm:$0xf0] }
  0x45   :  { %808 = vmatpush.bf16.msrb.mxu3 %v1446_v5  ;;  %v1438_v58 = vor.u32 %v1853_v43, %v1435_v46  ;;  %v1419_v1 = vld [vmem:[#allocation2 + $0xd8] sm:$0xf0] }
  0x46   :  { %v1627_v43 = vld [vmem:[#allocation2 + $0x278] sm:$0xf0] }
  0x47   :  { %821 = vmatpush.bf16.msra.mxu0 %v1590_v60  ;;  %v1673_v60 = vld [vmem:[#allocation2 + $0x2c8] sm:$0xf] }
  0x48   :  { %849 = vmatpush.bf16.msra.mxu2 %v1466_v63  ;;  %835 = vmatpush.bf16.msra.mxu1 %v1338_v13  ;;  %v1674_v5 = vor.u32 %v1915_v61, %v1673_v60  ;;  %v1403_v13 = vld [vmem:[#allocation2 + $0xb8] sm:$0xf0] }
  0x49   :  { %v1406_v23 = vor.u32 %v1845_v12, %v1403_v13  ;;  %v1891_v12 = vld [vmem:[#allocation2 + $0x214] sm:$0xf0]  ;;  %v1825_v13 = vld [vmem:[#allocation2 + $0xc] sm:$0xf] }
  0x4b   :  { %822 = vmatpush.bf16.msra.mxu0 %v1574_v9  ;;  %v1422_v9 = vor.u32 %v1849_v62, %v1419_v1  ;;  %v1593_v62 = vld [vmem:[#allocation2 + $0x228] sm:$0xf]  ;;  %v1829_v1 = vld [vmem:[#allocation2 + $0x2c] sm:$0xf] }
  0x4c   :  { %850 = vmatpush.bf16.msra.mxu2 %v1450_v10  ;;  %836 = vmatpush.bf16.msra.mxu1 %v1322_v16  ;;  %v1678_v10 = vor.u32 %v1913_v2, %v1675_v3  ;;  %v1909_v16 = vld [vmem:[#allocation2 + $0x2ac] sm:$0xf]  ;;  %v1339_v2 = vld [vmem:[#allocation2 + $0x38] sm:$0xf0] }
  0x4d   :  { %v1662_v24 = vor.u32 %v1909_v16, %v1659_v17  ;;  %v1889_v16 = vld [vmem:[#allocation2 + $0x20c] sm:$0xf]  ;;  %v1579_v17 = vld [vmem:[#allocation2 + $0x218] sm:$0xf0] }
  0x8b   :  { %v83_v19 = vpop.f32.mrf.mxu0  ;;  %v97_v20 = vpop.f32.mrf.mxu1 }
  0x8c   :  { %v116_v21 = vpack.c.bf16 %v97_v20, %v83_v19  ;;  %v1658_v20 = vor.u32 %v1911_v11, %v1657_v8 }
  0x8e   :  { %v135_v25 = vunpack.c.l.bf16 %v116_v21  ;;  %v136_v26 = vunpack.c.h.bf16 %v116_v21  ;;  %v1881_v21 = vld [vmem:[#allocation2 + $0x1cc] sm:$0xf] }
  0x90   :  { %v144_v35 = vadd.f32 %v141_v27, %v135_v25  ;;  %v145_v36 = vadd.f32 %v142_v28, %v136_v26  ;;  %v1641_v25 = vld [vmem:[#allocation2 + $0x288] sm:$0xf]  ;;  %v1907_v26 = vld [vmem:[#allocation2 + $0x294] sm:$0xf0] }
  0x92   :  { %v111_v29 = vpop.f32.mrf.mxu2  ;;  %v160_v49 = vmax.f32 %v144_v35, 0.0  ;;  %v161_v50 = vmax.f32 %v145_v36, 0.0 }
  0x93   :  { %v85_v30 = vpop.f32.mrf.mxu0  ;;  %v99_v31 = vpop.f32.mrf.mxu1  ;;  %v117_v33 = vpack.c.bf16 %v111_v29, %v111_v29  ;;  %v1905_v29 = vld [vmem:[#allocation2 + $0x28c] sm:$0xf] }
  0x94   :  { %v118_v32 = vpack.c.bf16 %v99_v31, %v85_v30  ;;  %v1643_v30 = vld [vmem:[#allocation2 + $0x298] sm:$0xf0]  ;;  %v1550_v31 = vor.u32 %v1881_v21, %v1547_v22 }
  0x95   :  { %v137_v44 = vunpack.c.l.bf16 %v117_v33  ;;  %v1877_v33 = vld [vmem:[#allocation2 + $0x1ac] sm:$0xf]  ;;  %v1646_v36 = vor.u32 %v1905_v29, %v1643_v30  ;;  %v1935_v29 = vld [vmem:[%s2177_s5 + $0x78] sm:$0xff] }
  0x96   :  { %v138_v37 = vunpack.c.l.bf16 %v118_v32  ;;  %v139_v38 = vunpack.c.h.bf16 %v118_v32  ;;  %v1642_v32 = vor.u32 %v1907_v26, %v1641_v25  ;;  %v1534_v41 = vor.u32 %v1877_v33, %v1531_v34  ;;  %v1857_v25 = vld [vmem:[#allocation2 + $0x10c] sm:$0xf]  ;;  %v1451_v26 = vld [vmem:[#allocation2 + $0x118] sm:$0xf0]  ;;  %v1923_v33 = vld [vmem:[%s2177_s5 + $0x18] sm:$0xff] }
  0x97   :  { %v146_v63 = vadd.f32 %v143_v45, %v137_v44  ;;  %v1873_v44 = vld [vmem:[#allocation2 + $0x18c] sm:$0xf]  ;;  %v1931_v34 = vld [vmem:[%s2177_s5 + $0x58] sm:$0xff] }
  0x98   :  { %v147_v39 = vadd.f32 %v141_v27, %v138_v37  ;;  %v148_v40 = vadd.f32 %v142_v28, %v139_v38  ;;  %v1841_v27 = vld [vmem:[#allocation2 + $0x8c] sm:$0xf]  ;;  %v1387_v28 = vld [vmem:[#allocation2 + $0x98] sm:$0xf0]  ;;  %v1625_v37 = vld [vmem:[#allocation2 + $0x268] sm:$0xf] }
  0x99   :  { %v162_v14 = vmax.f32 %v146_v63, 0.0  ;;  %v1390_v35 = vor.u32 %v1841_v27, %v1387_v28  ;;  %v1903_v38 = vld [vmem:[#allocation2 + $0x274] sm:$0xf0]  ;;  %v1454_v27 = vor.u32 %v1857_v25, %v1451_v26  ;;  %v1927_v28 = vld [vmem:[%s2177_s5 + $0x38] sm:$0xff]  ;;  %v1926_v30 = vld [vmem:[%s2177_s5 + $0x30] sm:$0xff] }
  0x9a   :  { %v163_v51 = vmax.f32 %v147_v39, 0.0  ;;  %v164_v52 = vmax.f32 %v148_v40, 0.0  ;;  %v113_v53 = vpop.f32.mrf.mxu2  ;;  %v1837_v39 = vld [vmem:[#allocation2 + $0x6c] sm:$0xf]  ;;  %v1371_v40 = vld [vmem:[#allocation2 + $0x78] sm:$0xf0]  ;;  %v1626_v46 = vor.u32 %v1903_v38, %v1625_v37 }
  0x9b   :  { %v119_v54 = vpack.c.bf16 %v113_v53, %v113_v53  ;;  %v1374_v47 = vor.u32 %v1837_v39, %v1371_v40  ;;  %v1922_v38 = vld [vmem:[%s2177_s5 + $0x10] sm:$0xff] }
  0x9c   :  { %v2049_v56 = vpack.c.bf16 %v163_v51, %v160_v49  ;;  %v2051_v57 = vpack.c.bf16 %v164_v52, %v161_v50  ;;  %v1630_v49 = vor.u32 %v1901_v42, %v1627_v43  ;;  %v1899_v50 = vld [vmem:[#allocation2 + $0x254] sm:$0xf0]  ;;  %v1833_v51 = vld [vmem:[#allocation2 + $0x4c] sm:$0xf]  ;;  %v1355_v52 = vld [vmem:[#allocation2 + $0x58] sm:$0xf0] }
  0x9d   :  { %v140_v0 = vunpack.c.l.bf16 %v119_v54  ;;  %v1897_v54 = vld [vmem:[#allocation2 + $0x24c] sm:$0xf]  ;;  %v1610_v60 = vor.u32 %v1899_v50, %v1609_v48  ;;  %v1358_v61 = vor.u32 %v1833_v51, %v1355_v52  ;;  %v1921_v43 = vld [vmem:[%s2177_s5 + $0x8] sm:$0xff]  ;;  %v1920_v50 = vld [vmem:[%s2177_s5] sm:$0xff] }
  0x9e   :  { %753 = vmatmul.bf16.vlgmr.msra.gmra.mxu3 %v2049_v56  ;;  %767 = vmatmul.bf16.vlgmr.msrb.gmra.mxu0 %v2051_v57  ;;  %v1930_v39 = vld [vmem:[%s2177_s5 + $0x50] sm:$0xff]  ;;  %v1949_v48 = vld [vmem:[%s2177_s5 + $0xe8] sm:$0xff]  ;;  %v1928_v51 = vld [vmem:[%s2177_s5 + $0x40] sm:$0xff] }
  0x9f   :  { %v149_v4 = vadd.f32 %v143_v45, %v140_v0  ;;  %795 = vmatmul.bf16.vlgmr.msrb.gmra.mxu2 %v2049_v56  ;;  %857 = vmatpush.bf16.msra.mxu3 %v1690_v55  ;;  %v1515_v45 = vld [vmem:[#allocation2 + $0x198] sm:$0xf0]  ;;  %v1895_v0 = vld [vmem:[#allocation2 + $0x234] sm:$0xf0]  ;;  %v1942_v40 = vld [vmem:[%s2177_s5 + $0xb0] sm:$0xff] }
  0xa0   :  { %871 = vmatpush.bf16.msrb.mxu0 %v1438_v58  ;;  %899 = vmatpush.bf16.msrb.mxu2 %v1694_v59  ;;  %v1518_v53 = vor.u32 %v1873_v44, %v1515_v45  ;;  %v1611_v55 = vld [vmem:[#allocation2 + $0x258] sm:$0xf0]  ;;  %v1869_v58 = vld [vmem:[#allocation2 + $0x16c] sm:$0xf]  ;;  %v1594_v8 = vor.u32 %v1895_v0, %v1593_v62  ;;  %v1929_v44 = vld [vmem:[%s2177_s5 + $0x48] sm:$0xff] }
  0xa1   :  { %v165_v15 = vmax.f32 %v149_v4, 0.0  ;;  %v1499_v59 = vld [vmem:[#allocation2 + $0x178] sm:$0xf0]  ;;  %v1614_v63 = vor.u32 %v1897_v54, %v1611_v55  ;;  %v1893_v4 = vld [vmem:[#allocation2 + $0x22c] sm:$0xf]  ;;  %v1941_v45 = vld [vmem:[%s2177_s5 + $0xa8] sm:$0xff] }
  0xa2   :  { %v1502_v3 = vor.u32 %v1869_v58, %v1499_v59  ;;  %v1940_v52 = vld [vmem:[%s2177_s5 + $0xa0] sm:$0xff]  ;;  %v1939_v55 = vld [vmem:[%s2177_s5 + $0x98] sm:$0xff]  ;;  %v1938_v62 = vld [vmem:[%s2177_s5 + $0x90] sm:$0xff] }
  0xa3   :  { %v2056_v19 = vpack.c.bf16 %v165_v15, %v162_v14  ;;  %858 = vmatpush.bf16.msra.mxu3 %v1674_v5  ;;  %v1595_v5 = vld [vmem:[#allocation2 + $0x238] sm:$0xf0]  ;;  %v1486_v15 = vor.u32 %v1865_v6, %v1483_v7  ;;  %v1947_v58 = vld [vmem:[%s2177_s5 + $0xd8] sm:$0xff] }
  0xa4   :  { %872 = vmatpush.bf16.msrb.mxu0 %v1422_v9  ;;  %900 = vmatpush.bf16.msrb.mxu2 %v1678_v10  ;;  %v1342_v9 = vor.u32 %v1829_v1, %v1339_v2  ;;  %v1577_v10 = vld [vmem:[#allocation2 + $0x208] sm:$0xf]  ;;  %v1598_v11 = vor.u32 %v1893_v4, %v1595_v5  ;;  %v1323_v14 = vld [vmem:[#allocation2 + $0x18] sm:$0xf0]  ;;  %v1945_v4 = vld [vmem:[%s2177_s5 + $0xc8] sm:$0xff] }
  0xa5   :  { %781 = vmatmul.bf16.vlgmr.msrb.gmra.mxu1 %v2056_v19  ;;  %v1578_v21 = vor.u32 %v1891_v12, %v1577_v10  ;;  %v1326_v22 = vor.u32 %v1825_v13, %v1323_v14  ;;  %v920_v0 = vld [vmem:[#allocation1] sm:$0xff]  ;;  %v921_v1 = vld [vmem:[#allocation1 + $0x9] sm:$0xff] }
  0xa6   :  { %885 = vmatpush.bf16.msrb.mxu1 %v1566_v18  ;;  %v1861_v18 = vld [vmem:[#allocation2 + $0x12c] sm:$0xf]  ;;  %v927_v10 = vpack.i.b16 %v921_v1, %v921_v1  ;;  %v1936_v13 = vld [vmem:[%s2177_s5 + $0x80] sm:$0xff] }
  0xa7   :  { %859 = vmatpush.bf16.msra.mxu3 %v1658_v20  ;;  %v1467_v20 = vld [vmem:[#allocation2 + $0x138] sm:$0xf0] }
  0xa8   :  { %873 = vmatpush.bf16.msrb.mxu0 %v1406_v23  ;;  %901 = vmatpush.bf16.msrb.mxu2 %v1662_v24  ;;  %v1582_v23 = vor.u32 %v1889_v16, %v1579_v17  ;;  %v1470_v24 = vor.u32 %v1861_v18, %v1467_v20  ;;  %v1944_v14 = vld [vmem:[%s2177_s5 + $0xc0] sm:$0xff]  ;;  %v929_v17 = vperm.slane %v927_v10, 0 }
  0xaa   :  { %886 = vmatpush.bf16.msrb.mxu1 %v1550_v31  ;;  %v1924_v31 = vld [vmem:[%s2177_s5 + $0x20] sm:$0xff]  ;;  %v945_v26 = vunpack.c.l.bf16 %v929_v17 }
  0xab   :  { %860 = vmatpush.bf16.msra.mxu3 %v1642_v32  ;;  %v1932_v32 = vld [vmem:[%s2177_s5 + $0x60] sm:$0xff] }
  0xac   :  { %874 = vmatpush.bf16.msrb.mxu0 %v1390_v35  ;;  %902 = vmatpush.bf16.msrb.mxu2 %v1646_v36  ;;  %v1943_v35 = vld [vmem:[%s2177_s5 + $0xb8] sm:$0xff] }
  0xad   :  { %v1951_v36 = vld [vmem:[%s2177_s5 + $0xf8] sm:$0xff] }
  0xae   :  { %887 = vmatpush.bf16.msrb.mxu1 %v1534_v41  ;;  %809 = vmatmul.bf16.vlgmr.msrb.gmra.mxu3 %v2051_v57  ;;  %v1950_v41 = vld [vmem:[%s2177_s5 + $0xf0] sm:$0xff] }
  0xaf   :  { %823 = vmatmul.bf16.vlgmr.msra.gmra.mxu0 %v2056_v19  ;;  %851 = vmatmul.bf16.vlgmr.msra.gmra.mxu2 %v2051_v57 }
  0xb0   :  { %861 = vmatpush.bf16.msra.mxu3 %v1626_v46  ;;  %875 = vmatpush.bf16.msrb.mxu0 %v1374_v47 }
  0xb1   :  { %903 = vmatpush.bf16.msrb.mxu2 %v1630_v49 }
  0xb2   :  { %888 = vmatpush.bf16.msrb.mxu1 %v1518_v53  ;;  %v1948_v53 = vld [vmem:[%s2177_s5 + $0xe0] sm:$0xff] }
  0xb4   :  { %862 = vmatpush.bf16.msra.mxu3 %v1610_v60  ;;  %876 = vmatpush.bf16.msrb.mxu0 %v1358_v61 }
  0xb5   :  { %904 = vmatpush.bf16.msrb.mxu2 %v1614_v63  ;;  %837 = vmatmul.bf16.vlgmr.msra.gmra.mxu1 %v2049_v56  ;;  %v1946_v63 = vld [vmem:[%s2177_s5 + $0xd0] sm:$0xff] }
  0xb6   :  { %889 = vmatpush.bf16.msrb.mxu1 %v1502_v3  ;;  %v1937_v3 = vld [vmem:[%s2177_s5 + $0x88] sm:$0xff] }
  0xb8   :  { %863 = vmatpush.bf16.msra.mxu3 %v1594_v8  ;;  %877 = vmatpush.bf16.msrb.mxu0 %v1342_v9  ;;  %v924_v9 = vpack.i.b16 %v920_v0, %v920_v0 }
  0xb9   :  { %905 = vmatpush.bf16.msrb.mxu2 %v1598_v11 }
  0xba   :  { %890 = vmatpush.bf16.msrb.mxu1 %v1486_v15  ;;  %v926_v16 = vperm.slane %v924_v9, 0 }
  0xbc   :  { %864 = vmatpush.bf16.msra.mxu3 %v1578_v21  ;;  %878 = vmatpush.bf16.msrb.mxu0 %v1326_v22  ;;  %v944_v25 = vunpack.c.l.bf16 %v926_v16 }
  0xbd   :  { %906 = vmatpush.bf16.msrb.mxu2 %v1582_v23 }
  0xbe   :  { %891 = vmatpush.bf16.msrb.mxu1 %v1470_v24 }
  0xbf   :  { %865 = vmatmul.bf16.vlgmr.msra.gmra.mxu3 %v2056_v19  ;;  %879 = vmatmul.bf16.vlgmr.msrb.gmra.mxu0 %v2049_v56  ;;  %v1934_v56 = vld [vmem:[%s2177_s5 + $0x70] sm:$0xff] }
  0xc0   :  { %907 = vmatmul.bf16.vlgmr.msrb.gmra.mxu2 %v2056_v19  ;;  %1240 = vmatpush.bf16.msrb.mxu3 %v1927_v28  ;;  %v1933_v19 = vld [vmem:[%s2177_s5 + $0x68] sm:$0xff] }
  0xc1   :  { %1254 = vmatpush.bf16.msra.mxu0 %v1935_v29  ;;  %1282 = vmatpush.bf16.msra.mxu2 %v1951_v36 }
  0xc2   :  { %892 = vmatpush.bf16.msrb.mxu1 %v1454_v27 }
  0xc4   :  { %1241 = vmatpush.bf16.msrb.mxu3 %v1926_v30 }
  0xc5   :  { %893 = vmatmul.bf16.vlgmr.msrb.gmra.mxu1 %v2051_v57  ;;  %1255 = vmatpush.bf16.msra.mxu0 %v1934_v56  ;;  %v1925_v57 = vld [vmem:[%s2177_s5 + $0x28] sm:$0xff] }
  0xc6   :  { %1268 = vmatpush.bf16.msra.mxu1 %v1943_v35  ;;  %1283 = vmatpush.bf16.msra.mxu2 %v1950_v41  ;;  %v923_v35 = vld [vmem:[#allocation1 + $0x1b] sm:$0xff] }
  0xc8   :  { %1242 = vmatpush.bf16.msrb.mxu3 %v1925_v57 }
  0xc9   :  { %1256 = vmatpush.bf16.msra.mxu0 %v1933_v19 }
  0xca   :  { %1269 = vmatpush.bf16.msra.mxu1 %v1942_v40  ;;  %1284 = vmatpush.bf16.msra.mxu2 %v1949_v48 }
  0xcc   :  { %1243 = vmatpush.bf16.msrb.mxu3 %v1924_v31 }
  0xcd   :  { %1257 = vmatpush.bf16.msra.mxu0 %v1932_v32 }
  0xce   :  { %1270 = vmatpush.bf16.msra.mxu1 %v1941_v45  ;;  %1285 = vmatpush.bf16.msra.mxu2 %v1948_v53 }
  0xd0   :  { %1244 = vmatpush.bf16.msrb.mxu3 %v1923_v33 }
  0xd1   :  { %1258 = vmatpush.bf16.msra.mxu0 %v1931_v34  ;;  %v922_v34 = vld [vmem:[#allocation1 + $0x12] sm:$0xff] }
  0xd2   :  { %1271 = vmatpush.bf16.msra.mxu1 %v1940_v52  ;;  %1286 = vmatpush.bf16.msra.mxu2 %v1947_v58 }
  0xd4   :  { %1245 = vmatpush.bf16.msrb.mxu3 %v1922_v38 }
  0xd5   :  { %1259 = vmatpush.bf16.msra.mxu0 %v1930_v39 }
  0xd6   :  { %1272 = vmatpush.bf16.msra.mxu1 %v1939_v55  ;;  %1287 = vmatpush.bf16.msra.mxu2 %v1946_v63 }
  0xd8   :  { %1246 = vmatpush.bf16.msrb.mxu3 %v1921_v43  ;;  %v933_v43 = vpack.i.b16 %v923_v35, %v923_v35 }
  0xd9   :  { %1260 = vmatpush.bf16.msra.mxu0 %v1929_v44 }
  0xda   :  { %1273 = vmatpush.bf16.msra.mxu1 %v1938_v62  ;;  %1288 = vmatpush.bf16.msra.mxu2 %v1945_v4 }
  0xdc   :  { %1247 = vmatpush.bf16.msrb.mxu3 %v1920_v50 }
  0xdd   :  { %1261 = vmatpush.bf16.msra.mxu0 %v1928_v51 }
  0xde   :  { %1274 = vmatpush.bf16.msra.mxu1 %v1937_v3  ;;  %1289 = vmatpush.bf16.msra.mxu2 %v1944_v14 }
  0xe2   :  { %1275 = vmatpush.bf16.msra.mxu1 %v1936_v13 }
 0x11b   :  { %v768_v37 = vpop.f32.mrf.mxu0 }
 0x121   :  { %v754_v42 = vpop.f32.mrf.mxu3 }
 0x122   :  { %v782_v46 = vpop.f32.mrf.mxu1  ;;  %v796_v47 = vpop.f32.mrf.mxu2  ;;  %v769_v5 = vadd.f32 %v768_v37, %v754_v42  ;;  %v930_v42 = vpack.i.b16 %v922_v34, %v922_v34 }
 0x123   :  { %v770_v49 = vpop.f32.mrf.mxu0 }
 0x124   :  { %v783_v15 = vadd.f32 %v782_v46, %v769_v5  ;;  %v932_v53 = vperm.slane %v930_v42, 0 }
 0x126   :  { %v946_v63 = vunpack.c.l.bf16 %v932_v53 }
 0x129   :  { %v756_v54 = vpop.f32.mrf.mxu3 }
 0x12a   :  { %v784_v59 = vpop.f32.mrf.mxu1  ;;  %v798_v60 = vpop.f32.mrf.mxu2  ;;  %v771_v18 = vadd.f32 %v770_v49, %v756_v54  ;;  %v935_v54 = vperm.slane %v933_v43, 0 }
 0x12c   :  { %v824_v61 = vpop.f32.mrf.mxu0  ;;  %v785_v27 = vadd.f32 %v784_v59, %v771_v18  ;;  %v947_v0 = vunpack.c.l.bf16 %v935_v54 }
 0x131   :  { %v810_v2 = vpop.f32.mrf.mxu3 }
 0x132   :  { %v811_v6 = vadd.f32 %v810_v2, %v796_v47  ;;  %v838_v7 = vpop.f32.mrf.mxu1  ;;  %v852_v8 = vpop.f32.mrf.mxu2 }
 0x133   :  { %v853_v48 = vadd.f32 %v852_v8, %v838_v7 }
 0x134   :  { %v825_v11 = vadd.f32 %v824_v61, %v811_v6  ;;  %v826_v12 = vpop.f32.mrf.mxu0 }
 0x136   :  { %v913_v20 = vpack.c.bf16 %v825_v11, %v783_v15 }
 0x138   :  { %v936_v28 = vunpack.c.l.bf16 %v913_v20  ;;  %v937_v29 = vunpack.c.h.bf16 %v913_v20 }
 0x139   :  { %v812_v21 = vpop.f32.mrf.mxu3 }
 0x13a   :  { %v813_v22 = vadd.f32 %v812_v21, %v798_v60  ;;  %v840_v23 = vpop.f32.mrf.mxu1  ;;  %v854_v24 = vpop.f32.mrf.mxu2  ;;  %v948_v19 = vadd.f32 %v944_v25, %v936_v28  ;;  %v949_v31 = vadd.f32 %v945_v26, %v937_v29  ;;  %v1955_v21 = vld [vmem:[%s2178_s6] ss:$0 sm:$0xff] }
 0x13b   :  { %v855_v61 = vadd.f32 %v854_v24, %v840_v23 }
 0x13c   :  { %v827_v30 = vadd.f32 %v826_v12, %v813_v22  ;;  %v880_v57 = vpop.f32.mrf.mxu0  ;;  %v968_v44 = vmax.f32 %v948_v19, 0.0  ;;  %v969_v45 = vmax.f32 %v949_v31, 0.0 }
 0x13e   :  { %v915_v56 = vpack.c.bf16 %v827_v30, %v785_v27 }
 0x140   :  { %v940_v32 = vunpack.c.l.bf16 %v915_v56  ;;  %v941_v33 = vunpack.c.h.bf16 %v915_v56 }
 0x142   :  { %v952_v36 = vadd.f32 %v944_v25, %v940_v32  ;;  %v953_v37 = vadd.f32 %v945_v26, %v941_v33  ;;  %v866_v38 = vpop.f32.mrf.mxu3  ;;  %v894_v39 = vpop.f32.mrf.mxu1 }
 0x143   :  { %v895_v40 = vadd.f32 %v894_v39, %v880_v57  ;;  %v908_v41 = vpop.f32.mrf.mxu2  ;;  %v867_v52 = vadd.f32 %v866_v38, %v853_v48 }
 0x144   :  { %v972_v46 = vmax.f32 %v952_v36, 0.0  ;;  %v973_v47 = vmax.f32 %v953_v37, 0.0  ;;  %v882_v58 = vpop.f32.mrf.mxu0 }
 0x145   :  { %v909_v49 = vadd.f32 %v908_v41, %v895_v40 }
 0x146   :  { %v976_v50 = vpack.c.bf16 %v972_v46, %v968_v44  ;;  %v977_v51 = vpack.c.bf16 %v973_v47, %v969_v45 }
 0x147   :  { %v914_v55 = vpack.c.bf16 %v909_v49, %v867_v52 }
 0x148   :  { %1248 = vmatmul.bf16.vlgmr.msrb.gmra.mxu3 %v976_v50  ;;  %1262 = vmatmul.bf16.vlgmr.msra.gmra.mxu0 %v977_v51 }
 0x149   :  { %v938_v2 = vunpack.c.l.bf16 %v914_v55  ;;  %v939_v3 = vunpack.c.h.bf16 %v914_v55 }
 0x14a   :  { %v868_v59 = vpop.f32.mrf.mxu3  ;;  %v896_v60 = vpop.f32.mrf.mxu1 }
 0x14b   :  { %v897_v62 = vadd.f32 %v896_v60, %v882_v58  ;;  %v910_v1 = vpop.f32.mrf.mxu2  ;;  %v869_v4 = vadd.f32 %v868_v59, %v855_v61  ;;  %v950_v7 = vadd.f32 %v946_v63, %v938_v2  ;;  %v951_v8 = vadd.f32 %v947_v0, %v939_v3 }
 0x14d   :  { %v911_v5 = vadd.f32 %v910_v1, %v897_v62  ;;  %v970_v13 = vmax.f32 %v950_v7, 0.0  ;;  %v971_v14 = vmax.f32 %v951_v8, 0.0 }
 0x14f   :  { %v916_v6 = vpack.c.bf16 %v911_v5, %v869_v4 }
 0x151   :  { %v942_v9 = vunpack.c.l.bf16 %v916_v6  ;;  %v943_v10 = vunpack.c.h.bf16 %v916_v6 }
 0x153   :  { %v954_v11 = vadd.f32 %v946_v63, %v942_v9  ;;  %v955_v12 = vadd.f32 %v947_v0, %v943_v10 }
 0x155   :  { %v974_v15 = vmax.f32 %v954_v11, 0.0  ;;  %v975_v16 = vmax.f32 %v955_v12, 0.0 }
 0x157   :  { %v978_v17 = vpack.c.bf16 %v974_v15, %v970_v13  ;;  %v979_v18 = vpack.c.bf16 %v975_v16, %v971_v14 }
 0x159   :  { %1276 = vmatmul.bf16.vlgmr.msra.gmra.mxu1 %v978_v17  ;;  %1290 = vmatmul.bf16.vlgmr.msra.gmra.mxu2 %v979_v18 }
 0x1c5   :  { %v1263_v23 = vpop.f32.mrf.mxu0 }
 0x1cb   :  { %v1249_v20 = vpop.f32.mrf.mxu3 }
 0x1cc   :  { %v1250_v22 = vadd.f32 %v1955_v21, %v1249_v20 }
 0x1cd   :  { %v1265_v56 = vpop.f32.mrf.mxu0 }
 0x1ce   :  { %v1264_v25 = vadd.f32 %v1263_v23, %v1250_v22 }
 0x1d3   :  { %v1251_v26 = vpop.f32.mrf.mxu3 }
 0x1d4   :  { %v1252_v29 = vadd.f32 %v1955_v21, %v1251_v26 }
 0x1d6   :  { %v1277_v24 = vpop.f32.mrf.mxu1  ;;  %v1266_v19 = vadd.f32 %v1265_v56, %v1252_v29 }
 0x1d7   :  { %v1278_v27 = vadd.f32 %v1277_v24, %v1264_v25 }
 0x1dc   :  { %v1291_v28 = vpop.f32.mrf.mxu2 }
 0x1dd   :  { %v1292_v30 = vadd.f32 %v1291_v28, %v1278_v27 }
 0x1de   :  { %v1279_v57 = vpop.f32.mrf.mxu1 }
 0x1df   :  { %1297 = vst.msk [vmem:[%s2179_s7] sm:$0xff] %vm1296_vm2, %v1292_v30  ;;  %v1280_v31 = vadd.f32 %v1279_v57, %v1266_v19 }
 0x1e4   :  { %v1293_v32 = vpop.f32.mrf.mxu2 }
 0x1e5   :  { %v1294_v33 = vadd.f32 %v1293_v32, %v1280_v31 }
 0x1e7   :  { %1298 = vst.msk [vmem:[%s2179_s7 + $0x8] sm:$0xff] %vm1296_vm2, %v1294_v33 }
 0x1e8   :  { %1303 = vsyncpa [#allocation3], 1 }

</bundles_post_ra>
